<compile_context>
chip_gen: v7x
topology: tpu7x:2x2x1
jax: 0.10.0
libtpu: 0.0.40
codegen_flags: <defaults>
</compile_context>

<pallas_src>
import jax
import jax.numpy as jnp
from jax.experimental import pallas as pl
from jax.experimental.pallas import tpu as pltpu


def _round_up(x, m):
    return (x + m - 1) // m * m


def _is_v7x():
    try:
        kind = jax.devices()[0].device_kind
    except Exception:
        return False
    k = kind.lower().replace(" ", "")
    return ("v7" in k) or ("tpu7" in k)


def _ge_kernel_vpu(x_ref, w_ref, o_ref):
    """Tiny-K path: K broadcast-FMAs on the VPU (f32 accumulation)."""
    x = x_ref[...].astype(jnp.float32)      # (TM, K)
    w = w_ref[...].astype(jnp.float32)      # (K, E)
    k_dim = x.shape[1]
    acc = x[:, 0:1] * w[0:1, :]             # (TM, 1) * (1, E) -> (TM, E)
    for k in range(1, k_dim):               # K is static -> unrolled
        acc = acc + x[:, k:k + 1] * w[k:k + 1, :]
    o_ref[...] = acc.astype(o_ref.dtype)


def _ge_kernel_mxu(x_ref, w_ref, o_ref):
    """General path: single MXU matmul with f32 accumulation."""
    o_ref[...] = jnp.dot(
        x_ref[...], w_ref[...], preferred_element_type=jnp.float32
    ).astype(o_ref.dtype)


def _choose_tile_m(M, K, E_pad, itemsize, target_tile_bytes):
    """Rows per grid step: ~target_tile_bytes of (x + out) VMEM per buffer,
    a multiple-of-8 divisor of M when possible (no masked/padded last block,
    no post-hoc output slice), and >=2 grid steps when cheap (megacore)."""
    row_bytes = (_round_up(K, 128) + E_pad) * itemsize   # VMEM rows are lane-padded
    target = max(8, min(8192, (target_tile_bytes // row_bytes) // 8 * 8))
    if M <= target:
        # Split small problems into two equal tiles so both TensorCores get work.
        if M >= 16 and M % 16 == 0:
            return M // 2
        return M
    # Largest multiple-of-8 divisor of M that is <= target.
    for cand in range(target, 7, -8):
        if M % cand == 0:
            return cand
    # Fallback: Pallas masks the final partial block (still no extra HBM copy).
    return target


def graph_embedding(inputs, embedding, *, io_dtype=jnp.float32, tile_m=None,
                    use_mxu=None, target_tile_bytes=8 << 20):
    """inputs: (B, input_size, seq_len); embedding: (input_size, E) -> (B, seq_len, E).

    io_dtype=jnp.bfloat16 halves HBM traffic (f32 accumulation, bf16 output) on
    v6e/v7x; the default float32 matches the torch reference semantics.
    """
    B, K, S = inputs.shape
    Kw, E = embedding.shape
    assert K == Kw and K >= 1, "input_size mismatch between inputs and embedding"

    M = B * S
    itemsize = jnp.dtype(io_dtype).itemsize

    # Flatten (B, S) -> M with K contiguous in the last dim (one XLA transpose;
    # input-side traffic is ~K/E of the output traffic, so this is cheap).
    x2 = jnp.transpose(inputs, (0, 2, 1)).reshape(M, K).astype(io_dtype)
    w = embedding.astype(io_dtype)

    # Lane-pad E so every output store is a full, unmasked vst.
    E_pad = _round_up(E, 128)
    if E_pad != E:
        w = jnp.pad(w, ((0, 0), (0, E_pad - E)))

    if tile_m is None:
        tm = _choose_tile_m(M, K, E_pad, itemsize, target_tile_bytes)
    else:
        tm = min(int(tile_m), M)
        if tm < M:
            tm = max(8, (tm // 8) * 8)

    grid = (pl.cdiv(M, tm),)

    # Kernel selection: tiny K on the VPU, otherwise MXU.  On v7x the VALU slot
    # saturates before the 3.2 TB/s store roofline, so even K=4 goes to the MXU.
    if use_mxu is None:
        vpu_max_k = 2 if _is_v7x() else 4
        use_mxu = K > vpu_max_k
    kernel = _ge_kernel_mxu if use_mxu else _ge_kernel_vpu
    # TODO(synk): for very large K (>~2048) add a trailing "arbitrary" K grid axis
    # with an f32 VMEM accumulator (pl.when init/finalize) so the contraction is
    # tiled and pipelined instead of loading the full (tm, K) block at once.

    # VMEM budget: lane/sublane-padded tiles, double-buffered pipelined x/out
    # blocks, the resident weight, plus compiler-internal scratch headroom.
    sub = 8 if itemsize >= 4 else 16
    x_tile = _round_up(tm, sub) * _round_up(K, 128) * itemsize
    o_tile = _round_up(tm, sub) * E_pad * itemsize
    w_tile = _round_up(K, sub) * E_pad * itemsize
    vmem_budget = 2 * (x_tile + o_tile) + 2 * w_tile + (8 << 20)
    vmem_budget = min(int(vmem_budget), 48 << 20)   # safe under v7x's 64 MiB VMEM

    cost = pl.CostEstimate(
        flops=2 * M * K * E_pad,
        transcendentals=0,
        bytes_accessed=(M * K + K * E_pad + M * E_pad) * itemsize,
    )

    out = pl.pallas_call(
        kernel,
        out_shape=jax.ShapeDtypeStruct((M, E_pad), io_dtype),
        grid_spec=pltpu.PrefetchScalarGridSpec(
            num_scalar_prefetch=0,
            grid=grid,
            in_specs=[
                pl.BlockSpec((tm, K), lambda m: (m, 0)),
                pl.BlockSpec((K, E_pad), lambda m: (0, 0)),  # weight resident in VMEM
            ],
            out_specs=pl.BlockSpec((tm, E_pad), lambda m: (m, 0)),
        ),
        compiler_params=pltpu.CompilerParams(
            dimension_semantics=("parallel",),
            vmem_limit_bytes=vmem_budget,
        ),
        cost_estimate=cost,
    )(x2, w)

    if E_pad != E:
        out = out[:, :E]
    return out.reshape(B, S, E)


if __name__ == "__main__":
    batch = 2
    input_size = 4
    seq_len = 8
    embedding_size = 128

    key = jax.random.PRNGKey(0)
    k_in, k_emb = jax.random.split(key)

    # Deterministic parameter init matching torch: uniform(-1/sqrt(E), 1/sqrt(E)).
    bound = 1.0 / (embedding_size ** 0.5)
    embedding = jax.random.uniform(
        k_emb, (input_size, embedding_size), dtype=jnp.float32,
        minval=-bound, maxval=bound)

    # Example inputs: (batch, input_size, seq_len), as in the torch module.
    inputs = jax.random.normal(k_in, (batch, input_size, seq_len), dtype=jnp.float32)

    out = graph_embedding(inputs, embedding)
    out = jax.block_until_ready(out)

    # Reference check (pure JAX) of the torch semantics.  Tolerance covers the
    # MXU route (multi-pass f32 matmul) taken on v7x; the VPU route used on
    # v5e/v6e for K<=4 is exact f32.
    ref = jnp.einsum("bks,ke->bse", inputs, embedding)
    assert out.shape == (batch, seq_len, embedding_size)
    assert jnp.allclose(out, ref, atol=5e-3, rtol=5e-3), float(
        jnp.max(jnp.abs(out - ref)))

    print("KERNEL_OK")
</pallas_src>

<mosaic_0001>
module attributes {stable_mosaic.version = 11 : i64} {
  func.func @_ge_kernel_vpu(%arg0: i32, %arg1: memref<8x4xf32, #tpu.memory_space<vmem>>, %arg2: memref<4x128xf32, #tpu.memory_space<vmem>>, %arg3: memref<8x128xf32, #tpu.memory_space<vmem>>) attributes {dimension_semantics = [#tpu.dimension_semantics<parallel>], iteration_bounds = array<i64: 2>, scalar_prefetch = 0 : i64, scratch_operands = 0 : i64, tpu.core_type = #tpu.core_type<tc>, window_params = [{transform_indices = @transform_0, window_bounds = array<i64: 8, 4>}, {pipeline_mode = #tpu.pipeline_mode<synchronous>, transform_indices = @transform_1, window_bounds = array<i64: 4, 128>}, {transform_indices = @transform_2, window_bounds = array<i64: 8, 128>}]} {
    %c0 = arith.constant 0 : index
    %c0_0 = arith.constant 0 : index
    %0 = vector.load %arg1[%c0, %c0_0] : memref<8x4xf32, #tpu.memory_space<vmem>>, vector<8x4xf32>
    %c0_1 = arith.constant 0 : index
    %c0_2 = arith.constant 0 : index
    %1 = vector.load %arg2[%c0_1, %c0_2] : memref<4x128xf32, #tpu.memory_space<vmem>>, vector<4x128xf32>
    %2 = vector.extract_strided_slice %0 {offsets = [0, 0], sizes = [8, 1], strides = [1, 1]} : vector<8x4xf32> to vector<8x1xf32>
    %3 = vector.extract_strided_slice %1 {offsets = [0, 0], sizes = [1, 128], strides = [1, 1]} : vector<4x128xf32> to vector<1x128xf32>
    %4 = vector.broadcast %2 : vector<8x1xf32> to vector<8x128xf32>
    %5 = vector.broadcast %3 : vector<1x128xf32> to vector<8x128xf32>
    %6 = arith.mulf %4, %5 : vector<8x128xf32>
    %7 = vector.extract_strided_slice %0 {offsets = [0, 1], sizes = [8, 1], strides = [1, 1]} : vector<8x4xf32> to vector<8x1xf32>
    %8 = vector.extract_strided_slice %1 {offsets = [1, 0], sizes = [1, 128], strides = [1, 1]} : vector<4x128xf32> to vector<1x128xf32>
    %9 = vector.broadcast %7 : vector<8x1xf32> to vector<8x128xf32>
    %10 = vector.broadcast %8 : vector<1x128xf32> to vector<8x128xf32>
    %11 = arith.mulf %9, %10 : vector<8x128xf32>
    %12 = arith.addf %6, %11 : vector<8x128xf32>
    %13 = vector.extract_strided_slice %0 {offsets = [0, 2], sizes = [8, 1], strides = [1, 1]} : vector<8x4xf32> to vector<8x1xf32>
    %14 = vector.extract_strided_slice %1 {offsets = [2, 0], sizes = [1, 128], strides = [1, 1]} : vector<4x128xf32> to vector<1x128xf32>
    %15 = vector.broadcast %13 : vector<8x1xf32> to vector<8x128xf32>
    %16 = vector.broadcast %14 : vector<1x128xf32> to vector<8x128xf32>
    %17 = arith.mulf %15, %16 : vector<8x128xf32>
    %18 = arith.addf %12, %17 : vector<8x128xf32>
    %19 = vector.extract_strided_slice %0 {offsets = [0, 3], sizes = [8, 1], strides = [1, 1]} : vector<8x4xf32> to vector<8x1xf32>
    %20 = vector.extract_strided_slice %1 {offsets = [3, 0], sizes = [1, 128], strides = [1, 1]} : vector<4x128xf32> to vector<1x128xf32>
    %21 = vector.broadcast %19 : vector<8x1xf32> to vector<8x128xf32>
    %22 = vector.broadcast %20 : vector<1x128xf32> to vector<8x128xf32>
    %23 = arith.mulf %21, %22 : vector<8x128xf32>
    %24 = arith.addf %18, %23 : vector<8x128xf32>
    %c0_3 = arith.constant 0 : index
    %c0_4 = arith.constant 0 : index
    %25 = vector.load %arg3[%c0_3, %c0_4] : memref<8x128xf32, #tpu.memory_space<vmem>>, vector<8x128xf32>
    tpu.vector_store %arg3[%c0_3, %c0_4], %24 {strides = array<i32>} : memref<8x128xf32, #tpu.memory_space<vmem>>, vector<8x128xf32>,
    return
  }
  func.func @transform_0(%arg0: i32) -> (i32, i32) {
    %c0_i32 = arith.constant 0 : i32
    %c0_i32_0 = arith.constant 0 : i32
    return %arg0, %c0_i32 : i32, i32
  }
  func.func @transform_1(%arg0: i32) -> (i32, i32) {
    %c0_i32 = arith.constant 0 : i32
    %c0_i32_0 = arith.constant 0 : i32
    %c0_i32_1 = arith.constant 0 : i32
    return %c0_i32, %c0_i32_0 : i32, i32
  }
  func.func @transform_2(%arg0: i32) -> (i32, i32) {
    %c0_i32 = arith.constant 0 : i32
    %c0_i32_0 = arith.constant 0 : i32
    return %arg0, %c0_i32 : i32, i32
  }
}

</mosaic_0001>

<bundles_post_ra>
// kernel: tpu_custom_call.1
= control target key start
LH: loop header
LB: loop body
LE: loop exit
PB: predicated region body
PF: predicated region fallthrough
CT: control target
= control target key end

     0   :  { %7 = vsyncpa [#allocation3], 0  ;;  %s500_s0 = inlined_call_operand.vmem [shape: f32[16,4], index: 0, kind: input, shape index: {}]   ;;  %s501_s1 = inlined_call_operand.vmem [shape: f32[4,128], index: 1, kind: input, shape index: {}]   ;;  %s502_s2 = inlined_call_operand.hbm [shape: f32[16,128], index: 2, kind: output, shape index: {}]  }
   0x1   :  { %9 = vsyncpa [#allocation3 + $0x1], 0  ;;  %s397_s9 = smov 0   ;;  %s399_s10 = smov 0  }
   0x2   :  { %s401_s11 = smov 0   ;;  %s403_s12 = smov 0  }
   0x3 LB: > { %s418_s13 = sadd.s32 4294967295, %s375_s12   ;;  %s255_s14 = sadd.s32 4294967294, %s375_s12   ;;  %s375_s12 = sphi %s403_s12, %s508_s12   ;;  %s371_s11 = sphi %s401_s11, %s507_s11   ;;  %s367_s10 = sphi %s399_s10, %s506_s10   ;;  %s363_s9 = sphi %s397_s9, %s505_s9  }
   0x4   : > { %s422_s15 = sadd.s32 1, %s375_s12   ;;  %s69_s16 = sadd.s32 1, %s371_s11 }
   0x5   : > { %s66_s17 = ssub.s32 %s375_s12, %s422_s15  ;;  %p79_p0 = scmp.ne.s32.totalorder %s371_s11, %s367_s10 }
   0x6   : > { %p67_p1 = scmp.eq.s32.totalorder %s66_s17, 0  ;;  %p80_p2 = scmp.eq.s32.totalorder %s418_s13, 1 }
   0x7   : > { %p85_p3 = scmp.ne.s32.totalorder %s367_s10, %s363_s9  ;;  %p86_p4 = scmp.eq.s32.totalorder %s255_s14, 1 }
   0x8   : > { %s433_s18 = scalar_select %p67_p1, %s371_s11, %s69_s16  }
   0x9   : > { %p435_p5 = por %p80_p2, %p79_p0  ;;  %p439_p6 = por %p86_p4, %p85_p3 }
   0xa   : > { %p258_p7 = scmp.ge.s32.totalorder %s375_s12, 1  ;;  %p114_p8 = scmp.lt.s32.totalorder %s375_s12, 3 }
   0xc   : > { %p115_p9 = pnand %p258_p7, %p114_p8 }
   0xd   : > { %p135_p10 = scmp.lt.s32.totalorder (!%p115_p9), %s418_s13, 1  ;;  %v377_v0 = vmov (!%p115_p9), 0   ;;  %v378_v1 = vmov (!%p115_p9), 2   ;;  %v379_v3 = vmov (!%p115_p9), 1   ;;  %v380_v4 = vmov (!%p115_p9), 3   ;;  %s132_s28 = sand.u32 (!%p115_p9), 1, %s367_s10  }
   0xe   : > { %118 = sbr.rel (%p115_p9) target bundleno = 181 (0xb5), region = 28  ;;  %308 = vset.pattern.permute.xlu0 (!%p115_p9), %v377_v0  ;;  %310 = vset.pattern.permute.xlu1 (!%p115_p9), %v378_v1  ;;  %v146_v5 = vlaneseq (!%p115_p9)  ;;  %v140_v9 = vld [vmem:[%s501_s1] sm:$0xf] (!%p115_p9)  ;;  %s259_s29 = sshll.u32 (!%p115_p9), %s132_s28, 3 }
   0xf   : > { %s262_s30 = sshll.u32 (!%p115_p9), %s418_s13, 7  ;;  %s134_s3 = scalar_lea.vmem (!%p115_p9), [#allocation2], %s259_s29 }
  0x10   : > { %v147_v6 = vshrl.u32 (!%p115_p9), %v146_v5, 7  ;;  %s196_s4 = sshll.u32 (!%p115_p9), %s134_s3, 4  ;;  %s458_s7 = scalar_lea.hbm (!%p115_p9), %s502_s2, %s262_s30  ;;  %s460_s4 = int_to_ptr.vmem [resolvable:$true] %s196_s4 }
  0x11   : > { %s183_s8 = scalar_lea.sflag (!%p115_p9), [#allocation3], %s132_s28  ;;  %s313_s14 = scalar_lea.vmem (!%p115_p9), %s460_s4, 128 }
  0x12   : > { %v148_v7 = vsub.s32 (!%p115_p9), 0, %v147_v6  ;;  %v157_v8 = vsub.s32 (!%p115_p9), 1, %v147_v6  ;;  %v167_v11 = vsub.s32 (!%p115_p9), 2, %v147_v6  ;;  %v177_v13 = vsub.s32 (!%p115_p9), 3, %v147_v6  ;;  %p314_p11 = scmp.ne.s32.totalorder (!%p115_p9), %s460_s4, %s313_s14 }
  0x14   : > { %v149_v14 = vrot.slane (!%p115_p9), %v140_v9, %v148_v7  ;;  %v158_v15 = vrot.slane (!%p115_p9), %v140_v9, %v157_v8  ;;  %v168_v16 = vrot.slane (!%p115_p9), %v140_v9, %v167_v11  ;;  %v178_v17 = vrot.slane (!%p115_p9), %v140_v9, %v177_v13  ;;  %p315_p12 = pnand (!%p115_p9), %p314_p11, %p435_p5 }
  0x15   : > { %s136_s21 = scalar_select %p135_p10, %s418_s13, 1 }
  0x16   : > { %p316_p13 = pneg %p315_p12  ;;  %s381_s13 = smov [#allocation2]  }
  0x17   : > { %s260_s22 = sshll.u32 %s136_s21, 3  ;;  %s317_s16 = sshll.u32 %s381_s13, 4  ;;  %s318_s16 = int_to_ptr.vmem [resolvable:$false] %s317_s16 }
  0x18   : > { %s138_s25 = scalar_lea.vmem %s500_s0, %s260_s22  ;;  %s319_s17 = scalar_lea.vmem %s318_s16, 256 }
  0x19   : > { %v139_v2 = vld [vmem:[%s138_s25] sm:$0xff]  ;;  %p320_p0 = scmp.lt.s32.totalorder %s460_s4, %s318_s16  ;;  %p321_p1 = scmp.lt.s32.totalorder %s319_s17, %s313_s14 }
  0x1a   : > { %143 = vperm.xlu0 %308, %v139_v2   ;;  %162 = vperm.xlu1 %310, %v139_v2  }
  0x1b   : > { %p322_p2 = por %p321_p1, %p320_p0 }
  0x1d   : > { %p323_p3 = pnand %p322_p2, %p316_p13 }
  0x1e   : > { %309 = vset.pattern.permute.xlu0 %v379_v3  ;;  %311 = vset.pattern.permute.xlu1 %v380_v4 }
  0x1f   : > { %152 = vperm.xlu0 %309, %v139_v2   ;;  %172 = vperm.xlu1 %311, %v139_v2  }
  0x23   : > { %312 = vset.pattern.permute.xlu0 %v380_v4 }
  0x99   : > { %v144_v10 = vpop.permute.xlu0 %143  ;;  %v163_v12 = vpop.permute.xlu1 %162 }
  0x9a   : > { %v150_v20 = vmul.f32 %v149_v14, %v144_v10  ;;  %v169_v22 = vmul.f32 %v168_v16, %v163_v12 }
  0x9e   : > { %v153_v18 = vpop.permute.xlu0 %152  ;;  %v173_v19 = vpop.permute.xlu1 %172 }
  0x9f   : > { %v159_v21 = vmul.f32 %v158_v15, %v153_v18  ;;  %v179_v24 = vmul.f32 %v178_v17, %v173_v19 }
  0xa1   : > { %v160_v23 = vadd.f32 %v159_v21, %v150_v20 }
  0xa3   : > { %v170_v25 = vadd.f32 %v169_v22, %v160_v23 }
  0xa5   : > { %v180_v26 = vadd.f32 %v179_v24, %v170_v25 }
  0xa7   : > { %181 = vst [vmem:[%s134_s3] sm:$0xff] %v180_v26 }
  0xa8   : > { %326 = shalt.err (!%p323_p3)
}
  0xa9   : > { %s327_s21 = scalar_lea.hbm %s458_s7, 128  ;;  %s331_s24 = scalar_lea.hbm %s502_s2, 256 }
  0xaa   : > { %p328_p4 = scmp.ne.s32.totalorder %s458_s7, %s327_s21  ;;  %p332_p9 = scmp.lt.u32.totalorder %s458_s7, %s502_s2 }
  0xab   : > { %p333_p10 = scmp.lt.u32.totalorder %s331_s24, %s327_s21  ;;  %p335_p12 = scmp.lt.u32.totalorder %s327_s21, %s458_s7 }
  0xac   : > { %p329_p7 = pnand %p328_p4, %p435_p5 }
  0xad   : > { %p334_p11 = por %p333_p10, %p332_p9 }
  0xae   : > { %p330_p8 = pneg %p329_p7 }
  0xaf   : > { %p336_p13 = por %p335_p12, %p334_p11 }
  0xb1   : > { %p337_p0 = pnand %p336_p13, %p330_p8 }
  0xb3   : > { %340 = shalt.err (!%p337_p0)
}
  0xb4   : > { %265 = dma.vmem_to_hbm [thread:$0]  (%p435_p5), %s460_s4, 128, %s458_s7, %s183_s8  }
  0xb5 PF: > { %p271_p1 = scmp.ge.s32.totalorder %s375_s12, 2  ;;  %s208_s27 = sand.u32 1, %s363_s9  }
  0xb6   : > { %s209_s28 = scalar_lea.sflag [#allocation3], %s208_s27 }
  0xb7   : > { %p268_p2 = pnand %p271_p1, %p439_p6 }
  0xb9   : > { %358 = dma.done.wait (!%p268_p2), %s209_s28, 128  }
  0xba   : > { %360 = vsyncadd (!%p268_p2), %s209_s28, 4294967168  ;;  %p12_p3 = scmp.ge.s32.totalorder %s422_s15, 4   ;;  %s505_s9 = smov %s367_s10 }
  0xbb   : > { %s506_s10 = smov %s371_s11  ;;  %s507_s11 = smov %s433_s18 }
  0xbc   : > { %s508_s12 = smov %s422_s15  ;;  %14 = sbr.rel (!%p12_p3) target bundleno = 3 (0x3), region = 63 }
  0xc3   :  { %214 = vsyncpa [#allocation3], 1 }
  0xc4   :  { %216 = vsyncpa [#allocation3 + $0x1], 1 }

</bundles_post_ra>
